<compile_context>
chip_gen: v6e
topology: v6e:2x2x1
jax: 0.10.0
libtpu: 0.0.40
codegen_flags: <defaults>
</compile_context>

<pallas_src>
import jax
import jax.numpy as jnp
from jax.experimental import pallas as pl
from jax.experimental.pallas import tpu as pltpu


def _round_up(x, m):
    return (x + m - 1) // m * m


def _cdiv(a, b):
    return -(-a // b)


# --------------------------------------------------------------------------------------
# Kernels
# --------------------------------------------------------------------------------------
def _ffn_kernel_resident(x_ref, w1_ref, b1_ref, w2_ref, b2_ref, o_ref):
    # Weights/biases have constant block indices -> fetched once, VMEM-resident for the grid.
    # x_ref: (tm, Dp)  w1_ref: (Dp, Hp)  b1_ref: (1, Hp)  w2_ref: (Hp, Dp)  b2_ref: (1, Dp)
    h = jnp.dot(x_ref[...], w1_ref[...], preferred_element_type=jnp.float32)
    h = jnp.maximum(h + b1_ref[...].astype(jnp.float32), 0.0)          # Linear + ReLU
    # TODO(synk): dropout (p = mca_DROPOUT_R) is identity at inference and is omitted here.
    out = jnp.dot(h.astype(w2_ref.dtype), w2_ref[...], preferred_element_type=jnp.float32)
    o_ref[...] = (out + b2_ref[...].astype(jnp.float32)).astype(o_ref.dtype)


def _ffn_kernel_streamed(x_ref, w1_ref, b1_ref, w2_ref, b2_ref, o_ref, acc_ref):
    # Hidden dim H is a tiled reduction (grid axis 1, 'arbitrary'); weights streamed per H tile.
    # x_ref: (tm, Dp)  w1_ref: (Dp, th)  b1_ref: (1, th)  w2_ref: (th, Dp)  b2_ref: (1, Dp)
    # o_ref: (tm, Dp)  acc_ref: (tm, Dp) f32
    j = pl.program_id(1)

    @pl.when(j == 0)
    def _():
        acc_ref[...] = jnp.zeros_like(acc_ref)

    h = jnp.dot(x_ref[...], w1_ref[...], preferred_element_type=jnp.float32)
    h = jnp.maximum(h + b1_ref[...].astype(jnp.float32), 0.0)          # Linear + ReLU
    # TODO(synk): dropout (p = mca_DROPOUT_R) is identity at inference and is omitted here.
    acc_ref[...] += jnp.dot(h.astype(w2_ref.dtype), w2_ref[...],
                            preferred_element_type=jnp.float32)

    @pl.when(j == pl.num_programs(1) - 1)
    def _():
        o_ref[...] = (acc_ref[...] + b2_ref[...].astype(jnp.float32)).astype(o_ref.dtype)


# --------------------------------------------------------------------------------------
# Wrapper
# --------------------------------------------------------------------------------------
def _vmem_capacity_bytes():
    """Physical per-core VMEM; conservative (v7x-safe) 64 MiB fallback if unqueryable."""
    cap = 64 << 20
    try:
        info = pltpu.get_tpu_info()
        cap = int(getattr(info, "vmem_capacity_bytes", cap))
    except Exception:
        pass
    return cap


def feed_forward(x, w1, b1, w2, b2, *, tm=512):
    """FFN forward: ReLU(x @ w1 + b1) @ w2 + b2.

    x: (B, S, D). w1: (D, H), b1: (H,), w2: (H, D), b2: (D,).
    For v5e, prefer passing bf16 x/w1/w2 (wrapper-level cast) — the kernel never casts
    matmul operands internally, so dtype is the dominant lever there.
    """
    B, S, D = x.shape
    H = w1.shape[1]
    M = B * S

    isz_x = jnp.dtype(x.dtype).itemsize
    isz_w = jnp.dtype(w1.dtype).itemsize

    # ---- lane-dense padding of feature dims ----
    Dp = _round_up(D, 128)
    # Hidden tile >= 256-512 (never gcd-collapsed to 128); Hp padded to a multiple of th.
    th = min(512, _round_up(H, 128))
    Hp = _round_up(H, th)

    cap = _vmem_capacity_bytes()
    budget = cap - (12 << 20)              # headroom for compiler-internal scratch

    # ---- resident fast path vs H-streamed path ----
    # Fast path budget: 2x weights (Pallas allocates double buffers even for constant blocks),
    # sublane-padded biases, plus per-row-tile bytes for x/out double buffers and the f32
    # intermediate h (with its cast copy).
    resident_fixed = 2 * (2 * Dp * Hp) * isz_w + 2 * 8 * (Hp + Dp) * isz_w
    per_tm_resident = 4 * Dp * isz_x + Hp * (4 + isz_w)
    use_resident = resident_fixed + 16 * per_tm_resident <= budget

    if use_resident:
        th = Hp
        n_h = 1
        fixed, per_tm = resident_fixed, per_tm_resident
    else:
        def stream_cost(t):
            fxd = 2 * (2 * Dp * t) * isz_w + 2 * 8 * (t + Dp) * isz_w
            per = 4 * Dp * isz_x + 4 * Dp + t * (4 + isz_w)   # x/out bufs + f32 acc + h tile
            return fxd, per

        fixed, per_tm = stream_cost(th)
        if budget - fixed < 16 * per_tm and th > 128:
            th = 128                     # Hp is a multiple of 128, so this still tiles evenly
            fixed, per_tm = stream_cost(th)
        n_h = Hp // th

    # ---- row tile selection ----
    avail = max(budget - fixed, 16 * per_tm)
    tm_cap = max(16, (avail // per_tm) // 16 * 16)
    tm = max(16, min(_round_up(tm, 16), tm_cap, _round_up(M, 16)))

    Mp = _round_up(M, tm)
    if Mp - M > tm // 2:                 # balance tiles: avoid a mostly-zero last row tile
        n_tiles = _cdiv(M, tm)
        tm = _round_up(_cdiv(M, n_tiles), 16)
        Mp = _round_up(M, tm)

    n_row = Mp // tm
    if n_row == 1 and M >= 256:          # give both v7x TensorCores work (cheap on 1-TC chips)
        tm = _round_up(_cdiv(M, 2), 16)
        Mp = _round_up(M, tm)
        n_row = Mp // tm

    # ---- pad operands to the lane-dense layout ----
    x2d = jnp.pad(x.reshape(M, D), ((0, Mp - M), (0, Dp - D)))
    w1p = jnp.pad(w1, ((0, Dp - D), (0, Hp - H)))
    b1p = jnp.pad(b1, (0, Hp - H)).reshape(1, Hp)
    w2p = jnp.pad(w2, ((0, Hp - H), (0, Dp - D)))
    b2p = jnp.pad(b2, (0, Dp - D)).reshape(1, Dp)

    # ---- VMEM limit (capped below physical capacity; v7x-safe) ----
    vmem_bytes = fixed + tm * per_tm
    vmem_limit = int(min(cap - (4 << 20), max(32 << 20, vmem_bytes * 3 // 2)))

    weight_bytes = 2 * Dp * Hp * isz_w * (1 if n_h == 1 else n_row)
    cost = pl.CostEstimate(
        flops=4 * Mp * Dp * Hp,
        transcendentals=0,
        bytes_accessed=2 * Mp * Dp * isz_x + weight_bytes + (Hp + Dp) * isz_w,
    )

    if use_resident:
        grid = (n_row,)
        in_specs = [
            pl.BlockSpec((tm, Dp), lambda i: (i, 0)),     # x row tile
            pl.BlockSpec((Dp, Hp), lambda i: (0, 0)),     # w1 (fetched once)
            pl.BlockSpec((1, Hp), lambda i: (0, 0)),      # b1 (fetched once)
            pl.BlockSpec((Hp, Dp), lambda i: (0, 0)),     # w2 (fetched once)
            pl.BlockSpec((1, Dp), lambda i: (0, 0)),      # b2 (fetched once)
        ]
        out_specs = pl.BlockSpec((tm, Dp), lambda i: (i, 0))
        scratch_shapes = ()
        kernel = _ffn_kernel_resident
        dim_sem = ("parallel",)
    else:
        grid = (n_row, n_h)                                # H (reduction) axis last
        in_specs = [
            pl.BlockSpec((tm, Dp), lambda i, j: (i, 0)),   # x row tile (constant over j)
            pl.BlockSpec((Dp, th), lambda i, j: (0, j)),   # w1 H-tile
            pl.BlockSpec((1, th), lambda i, j: (0, j)),    # b1 H-tile
            pl.BlockSpec((th, Dp), lambda i, j: (j, 0)),   # w2 H-tile
            pl.BlockSpec((1, Dp), lambda i, j: (0, 0)),    # b2
        ]
        out_specs = pl.BlockSpec((tm, Dp), lambda i, j: (i, 0))
        scratch_shapes = (pltpu.VMEM((tm, Dp), jnp.float32),)
        kernel = _ffn_kernel_streamed
        dim_sem = ("parallel", "arbitrary")

    out2d = pl.pallas_call(
        kernel,
        out_shape=jax.ShapeDtypeStruct((Mp, Dp), x.dtype),
        grid_spec=pltpu.PrefetchScalarGridSpec(
            num_scalar_prefetch=0,
            grid=grid,
            in_specs=in_specs,
            out_specs=out_specs,
            scratch_shapes=scratch_shapes,
        ),
        compiler_params=pltpu.CompilerParams(
            dimension_semantics=dim_sem,
            vmem_limit_bytes=vmem_limit,
        ),
        cost_estimate=cost,
    )(x2d, w1p, b1p, w2p, b2p)

    return out2d[:M, :D].reshape(B, S, D)


def _reference(x, w1, b1, w2, b2):
    h = jnp.maximum(jnp.einsum("bsd,dh->bsh", x, w1) + b1, 0.0)
    return jnp.einsum("bsh,hd->bsd", h, w2) + b2


if __name__ == "__main__":
    # Small shapes consistent with the module: hidden D (mca_HIDDEN_SIZE), feed-forward H.
    B, S, D, H = 2, 8, 32, 64

    key = jax.random.PRNGKey(0)
    kx, kw1, kb1, kw2, kb2 = jax.random.split(key, 5)

    x = jax.random.normal(kx, (B, S, D), dtype=jnp.float32)
    # deterministic, PyTorch-Linear-style uniform init scales
    w1 = jax.random.uniform(kw1, (D, H), jnp.float32, -1.0, 1.0) / jnp.sqrt(D)
    b1 = jax.random.uniform(kb1, (H,), jnp.float32, -1.0, 1.0) / jnp.sqrt(D)
    w2 = jax.random.uniform(kw2, (H, D), jnp.float32, -1.0, 1.0) / jnp.sqrt(H)
    b2 = jax.random.uniform(kb2, (D,), jnp.float32, -1.0, 1.0) / jnp.sqrt(H)

    out = feed_forward(x, w1, b1, w2, b2)
    out = jax.block_until_ready(out)

    ref = _reference(x, w1, b1, w2, b2)
    assert out.shape == (B, S, D)
    # NOTE: the 1e-5 tolerance is for the f32 path; bf16 inputs need a looser tolerance.
    assert jnp.allclose(out, ref, atol=1e-5, rtol=1e-5), "mismatch vs reference"

    print("KERNEL_OK")
</pallas_src>

<mosaic_0001>
module attributes {stable_mosaic.version = 11 : i64} {
  func.func @_ffn_kernel_resident(%arg0: i32, %arg1: memref<16x128xf32, #tpu.memory_space<vmem>>, %arg2: memref<128x128xf32, #tpu.memory_space<vmem>>, %arg3: memref<1x128xf32, #tpu.memory_space<vmem>>, %arg4: memref<128x128xf32, #tpu.memory_space<vmem>>, %arg5: memref<1x128xf32, #tpu.memory_space<vmem>>, %arg6: memref<16x128xf32, #tpu.memory_space<vmem>>) attributes {dimension_semantics = [#tpu.dimension_semantics<parallel>], iteration_bounds = array<i64: 1>, scalar_prefetch = 0 : i64, scratch_operands = 0 : i64, tpu.core_type = #tpu.core_type<tc>, window_params = [{transform_indices = @transform_0, window_bounds = array<i64: 16, 128>}, {pipeline_mode = #tpu.pipeline_mode<synchronous>, transform_indices = @transform_1, window_bounds = array<i64: 128, 128>}, {pipeline_mode = #tpu.pipeline_mode<synchronous>, transform_indices = @transform_2, window_bounds = array<i64: 1, 128>}, {pipeline_mode = #tpu.pipeline_mode<synchronous>, transform_indices = @transform_3, window_bounds = array<i64: 128, 128>}, {pipeline_mode = #tpu.pipeline_mode<synchronous>, transform_indices = @transform_4, window_bounds = array<i64: 1, 128>}, {transform_indices = @transform_5, window_bounds = array<i64: 16, 128>}]} {
    %c0 = arith.constant 0 : index
    %c0_0 = arith.constant 0 : index
    %0 = vector.load %arg1[%c0, %c0_0] : memref<16x128xf32, #tpu.memory_space<vmem>>, vector<16x128xf32>
    %c0_1 = arith.constant 0 : index
    %c0_2 = arith.constant 0 : index
    %1 = vector.load %arg2[%c0_1, %c0_2] : memref<128x128xf32, #tpu.memory_space<vmem>>, vector<128x128xf32>
    %cst = arith.constant dense<0.000000e+00> : vector<16x128xf32>
    %2 = tpu.matmul %0, %1, %cst {dimension_numbers = #tpu.dot_dimension_numbers<[1], [0], [0], [1], [0, 0, 1, 1], [], []>} : vector<16x128xf32>, vector<128x128xf32>, vector<16x128xf32> -> vector<16x128xf32>
    %c0_3 = arith.constant 0 : index
    %c0_4 = arith.constant 0 : index
    %3 = vector.load %arg3[%c0_3, %c0_4] : memref<1x128xf32, #tpu.memory_space<vmem>>, vector<1x128xf32>
    %4 = vector.broadcast %3 : vector<1x128xf32> to vector<16x128xf32>
    %5 = arith.addf %2, %4 : vector<16x128xf32>
    %cst_5 = arith.constant 0.000000e+00 : f32
    %6 = vector.broadcast %cst_5 : f32 to vector<16x128xf32>
    %7 = arith.maximumf %5, %6 : vector<16x128xf32>
    %c0_6 = arith.constant 0 : index
    %c0_7 = arith.constant 0 : index
    %8 = vector.load %arg4[%c0_6, %c0_7] : memref<128x128xf32, #tpu.memory_space<vmem>>, vector<128x128xf32>
    %cst_8 = arith.constant dense<0.000000e+00> : vector<16x128xf32>
    %9 = tpu.matmul %7, %8, %cst_8 {dimension_numbers = #tpu.dot_dimension_numbers<[1], [0], [0], [1], [0, 0, 1, 1], [], []>} : vector<16x128xf32>, vector<128x128xf32>, vector<16x128xf32> -> vector<16x128xf32>
    %c0_9 = arith.constant 0 : index
    %c0_10 = arith.constant 0 : index
    %10 = vector.load %arg5[%c0_9, %c0_10] : memref<1x128xf32, #tpu.memory_space<vmem>>, vector<1x128xf32>
    %11 = vector.broadcast %10 : vector<1x128xf32> to vector<16x128xf32>
    %12 = arith.addf %9, %11 : vector<16x128xf32>
    %c0_11 = arith.constant 0 : index
    %c0_12 = arith.constant 0 : index
    %13 = vector.load %arg6[%c0_11, %c0_12] : memref<16x128xf32, #tpu.memory_space<vmem>>, vector<16x128xf32>
    tpu.vector_store %arg6[%c0_11, %c0_12], %12 {strides = array<i32>} : memref<16x128xf32, #tpu.memory_space<vmem>>, vector<16x128xf32>,
    return
  }
  func.func @transform_0(%arg0: i32) -> (i32, i32) {
    %c0_i32 = arith.constant 0 : i32
    %c0_i32_0 = arith.constant 0 : i32
    return %arg0, %c0_i32 : i32, i32
  }
  func.func @transform_1(%arg0: i32) -> (i32, i32) {
    %c0_i32 = arith.constant 0 : i32
    %c0_i32_0 = arith.constant 0 : i32
    %c0_i32_1 = arith.constant 0 : i32
    return %c0_i32, %c0_i32_0 : i32, i32
  }
  func.func @transform_2(%arg0: i32) -> (i32, i32) {
    %c0_i32 = arith.constant 0 : i32
    %c0_i32_0 = arith.constant 0 : i32
    %c0_i32_1 = arith.constant 0 : i32
    return %c0_i32, %c0_i32_0 : i32, i32
  }
  func.func @transform_3(%arg0: i32) -> (i32, i32) {
    %c0_i32 = arith.constant 0 : i32
    %c0_i32_0 = arith.constant 0 : i32
    %c0_i32_1 = arith.constant 0 : i32
    return %c0_i32, %c0_i32_0 : i32, i32
  }
  func.func @transform_4(%arg0: i32) -> (i32, i32) {
    %c0_i32 = arith.constant 0 : i32
    %c0_i32_0 = arith.constant 0 : i32
    %c0_i32_1 = arith.constant 0 : i32
    return %c0_i32, %c0_i32_0 : i32, i32
  }
  func.func @transform_5(%arg0: i32) -> (i32, i32) {
    %c0_i32 = arith.constant 0 : i32
    %c0_i32_0 = arith.constant 0 : i32
    return %arg0, %c0_i32 : i32, i32
  }
}

</mosaic_0001>

<bundles_post_ra>
// kernel: tpu_custom_call.1
= control target key start
LH: loop header
LB: loop body
LE: loop exit
PB: predicated region body
PF: predicated region fallthrough
CT: control target
= control target key end

     0   :  { %10 = vsyncpa [#allocation3], 0  ;;  %s548_s0 = inlined_call_operand.hbm [shape: f32[16,128], index: 0, kind: input, shape index: {}]   ;;  %s549_s1 = inlined_call_operand.hbm [shape: f32[128,128], index: 1, kind: input, shape index: {}]   ;;  %s550_s2 = inlined_call_operand.vmem [shape: f32[1,128], index: 2, kind: input, shape index: {}]   ;;  %s551_s3 = inlined_call_operand.hbm [shape: f32[128,128], index: 3, kind: input, shape index: {}]   ;;  %s552_s4 = inlined_call_operand.vmem [shape: f32[1,128], index: 4, kind: input, shape index: {}]   ;;  %s553_s5 = inlined_call_operand.hbm [shape: f32[16,128], index: 5, kind: output, shape index: {}]  }
   0x1   :  { %11 = vsyncpa [#allocation6], 0 }
   0x2   :  { %12 = vsyncpa [#allocation4], 0  ;;  %s482_s18 = smov [#allocation5]   ;;  %s483_s20 = smov [#allocation2]  }
   0x3   :  { %s30_s19 = sshll.u32 %s482_s18, 4  ;;  %s18_s21 = sshll.u32 %s483_s20, 4  ;;  %s31_s19 = int_to_ptr.vmem [resolvable:$true] %s30_s19  ;;  %s19_s21 = int_to_ptr.vmem [resolvable:$true] %s18_s21 }
   0x4   :  { %s404_s22 = scalar_lea.vmem %s31_s19, 2048  ;;  %p409_p1 = scmp.lt.s32.totalorder %s31_s19, %s31_s19 }
   0x5   :  { %p405_p0 = scmp.ne.s32.totalorder %s31_s19, %s404_s22  ;;  %p410_p2 = scmp.lt.s32.totalorder %s404_s22, %s404_s22 }
   0x7   :  { %p411_p3 = por %p410_p2, %p409_p1 }
   0x9   :  { %p412_p4 = pnand %p411_p3, %p405_p0 }
   0xb   :  { %415 = shalt.err (!%p412_p4)
}
   0xc   :  { %s484_s23 = smov 128   ;;  %s485_s24 = smov 8  }
   0xd   :  { %36 = dma.hbm_to_vmem [thread:$0]  %s549_s1, 2048, %s31_s19, [#allocation6], %s484_s23, %s484_s23, %s485_s24  }
   0xe   :  { %s424_s27 = scalar_lea.vmem %s19_s21, 256  ;;  %p429_p6 = scmp.lt.s32.totalorder %s19_s21, %s19_s21 }
   0xf   :  { %p425_p5 = scmp.ne.s32.totalorder %s19_s21, %s424_s27  ;;  %p430_p7 = scmp.lt.s32.totalorder %s424_s27, %s424_s27 }
  0x11   :  { %p431_p8 = por %p430_p7, %p429_p6 }
  0x13   :  { %p432_p9 = pnand %p431_p8, %p425_p5 }
  0x15   :  { %435 = shalt.err (!%p432_p9)
}
  0x16   :  { %24 = dma.hbm_to_vmem [thread:$0]  %s548_s0, 256, %s19_s21, [#allocation3], %s484_s23, %s484_s23, %s485_s24  }
  0x17   :  { %s486_s30 = smov [#allocation7]  }
  0x18   :  { %s44_s6 = sshll.u32 %s486_s30, 4  ;;  %s45_s6 = int_to_ptr.vmem [resolvable:$true] %s44_s6 }
  0x19   :  { %s444_s7 = scalar_lea.vmem %s45_s6, 2048  ;;  %p449_p11 = scmp.lt.s32.totalorder %s45_s6, %s45_s6 }
  0x1a   :  { %p445_p10 = scmp.ne.s32.totalorder %s45_s6, %s444_s7  ;;  %p450_p12 = scmp.lt.s32.totalorder %s444_s7, %s444_s7 }
  0x1c   :  { %p451_p13 = por %p450_p12, %p449_p11 }
  0x1e   :  { %p452_p0 = pnand %p451_p13, %p445_p10 }
  0x20   :  { %455 = shalt.err (!%p452_p0)
}
  0x21   :  { %50 = dma.hbm_to_vmem [thread:$0]  %s551_s3, 2048, %s45_s6, [#allocation6], %s484_s23, %s484_s23, %s485_s24  }
  0x22   :  { %476 = dma.done.wait [#allocation3], 256  }
  0x23   :  { %477 = vsyncadd [#allocation3], 4294967040 }
  0x24   :  { %478 = dma.done.wait [#allocation6], 4096  }
  0x25   :  { %479 = vsyncadd [#allocation6], 4294963200  ;;  %v79_v0 = vld [vmem:[#allocation5 + $0x78] sm:$0xff]  ;;  %v78_v1 = vld [vmem:[#allocation5 + $0x70] sm:$0xff]  ;;  %s487_s11 = smov [#allocation8]  }
  0x26   :  { %320 = vmatprep.subr.mxu0 %v79_v0  ;;  %v77_v2 = vld [vmem:[#allocation5 + $0x68] sm:$0xff]  ;;  %v76_v3 = vld [vmem:[#allocation5 + $0x60] sm:$0xff]  ;;  %v62_v4 = vld [vmem:[#allocation2] sm:$0xff]  ;;  %s269_s12 = sshll.u32 %s487_s11, 4  ;;  %s270_s12 = int_to_ptr.vmem [resolvable:$true] %s269_s12 }
  0x27   :  { %321 = vmatpush3.msra.mxu0 %v79_v0  ;;  %v75_v5 = vld [vmem:[#allocation5 + $0x58] sm:$0xff]  ;;  %352 = vmatprep.mubr.f32.mxu0 %v62_v4  ;;  %v178_v7 = vld [vmem:[#allocation7 + $0x70] sm:$0xff]  ;;  %v177_v9 = vld [vmem:[#allocation7 + $0x68] sm:$0xff]  ;;  %p461_p2 = scmp.lt.s32.totalorder %s270_s12, %s270_s12 }
  0x28   :  { %322 = vmatprep.subr.mxu0 %v78_v1  ;;  %v179_v6 = vld [vmem:[#allocation7 + $0x78] sm:$0xff]  ;;  %v74_v8 = vld [vmem:[#allocation5 + $0x50] sm:$0xff]  ;;  %v73_v10 = vld [vmem:[#allocation5 + $0x48] sm:$0xff] }
  0x29   :  { %323 = vmatpush3.msra.mxu0 %v78_v1  ;;  %355 = vmatprep.subr.mxu1 %v179_v6  ;;  %v176_v11 = vld [vmem:[#allocation7 + $0x60] sm:$0xff]  ;;  %v175_v13 = vld [vmem:[#allocation7 + $0x58] sm:$0xff]  ;;  %v174_v15 = vld [vmem:[#allocation7 + $0x50] sm:$0xff] }
  0x2a   :  { %324 = vmatprep.subr.mxu0 %v77_v2  ;;  %356 = vmatpush3.msra.mxu1 %v179_v6  ;;  %v72_v12 = vld [vmem:[#allocation5 + $0x40] sm:$0xff]  ;;  %v71_v14 = vld [vmem:[#allocation5 + $0x38] sm:$0xff]  ;;  %v70_v16 = vld [vmem:[#allocation5 + $0x30] sm:$0xff] }
  0x2b   :  { %325 = vmatpush3.msra.mxu0 %v77_v2  ;;  %357 = vmatprep.subr.mxu1 %v178_v7  ;;  %v173_v17 = vld [vmem:[#allocation7 + $0x48] sm:$0xff]  ;;  %v172_v19 = vld [vmem:[#allocation7 + $0x40] sm:$0xff]  ;;  %v171_v21 = vld [vmem:[#allocation7 + $0x38] sm:$0xff] }
  0x2c   :  { %326 = vmatprep.subr.mxu0 %v76_v3  ;;  %358 = vmatpush3.msra.mxu1 %v178_v7  ;;  %v69_v18 = vld [vmem:[#allocation5 + $0x28] sm:$0xff]  ;;  %v68_v20 = vld [vmem:[#allocation5 + $0x20] sm:$0xff]  ;;  %v67_v22 = vld [vmem:[#allocation5 + $0x18] sm:$0xff] }
  0x2d   :  { %327 = vmatpush3.msra.mxu0 %v76_v3  ;;  %359 = vmatprep.subr.mxu1 %v177_v9  ;;  %v170_v23 = vld [vmem:[#allocation7 + $0x30] sm:$0xff]  ;;  %v169_v25 = vld [vmem:[#allocation7 + $0x28] sm:$0xff]  ;;  %v168_v27 = vld [vmem:[#allocation7 + $0x20] sm:$0xff] }
  0x2e   :  { %328 = vmatprep.subr.mxu0 %v75_v5  ;;  %360 = vmatpush3.msra.mxu1 %v177_v9  ;;  %v66_v24 = vld [vmem:[#allocation5 + $0x10] sm:$0xff]  ;;  %v65_v26 = vld [vmem:[#allocation5 + $0x8] sm:$0xff]  ;;  %v64_v28 = vld [vmem:[#allocation5] sm:$0xff] }
  0x2f   :  { %329 = vmatpush3.msra.mxu0 %v75_v5  ;;  %361 = vmatprep.subr.mxu1 %v176_v11  ;;  %v63_v29 = vld [vmem:[#allocation2 + $0x8] sm:$0xff]  ;;  %v166_v31 = vld [vmem:[#allocation7 + $0x10] sm:$0xff]  ;;  %v165_v32 = vld [vmem:[#allocation7 + $0x8] sm:$0xff] }
  0x30   :  { %330 = vmatprep.subr.mxu0 %v74_v8  ;;  %362 = vmatpush3.msra.mxu1 %v176_v11  ;;  %v167_v30 = vld [vmem:[#allocation7 + $0x18] sm:$0xff]  ;;  %v164_v33 = vld [vmem:[#allocation7] sm:$0xff]  ;;  %v282_v34 = vld [vmem:[%s550_s2] ss:$0 sm:$0xff]  ;;  %s456_s2 = scalar_lea.vmem %s270_s12, 256 }
  0x31   :  { %331 = vmatpush3.msra.mxu0 %v74_v8  ;;  %363 = vmatprep.subr.mxu1 %v175_v13  ;;  %v283_v41 = vld [vmem:[%s552_s4] ss:$0 sm:$0xff]  ;;  %p457_p1 = scmp.ne.s32.totalorder %s270_s12, %s456_s2  ;;  %p462_p3 = scmp.lt.s32.totalorder %s456_s2, %s456_s2 }
  0x32   :  { %332 = vmatprep.subr.mxu0 %v73_v10  ;;  %364 = vmatpush3.msra.mxu1 %v175_v13 }
  0x33   :  { %333 = vmatpush3.msra.mxu0 %v73_v10  ;;  %365 = vmatprep.subr.mxu1 %v174_v15  ;;  %p463_p4 = por %p462_p3, %p461_p2 }
  0x34   :  { %334 = vmatprep.subr.mxu0 %v72_v12  ;;  %366 = vmatpush3.msra.mxu1 %v174_v15 }
  0x35   :  { %335 = vmatpush3.msra.mxu0 %v72_v12  ;;  %367 = vmatprep.subr.mxu1 %v173_v17  ;;  %p464_p5 = pnand %p463_p4, %p457_p1 }
  0x36   :  { %336 = vmatprep.subr.mxu0 %v71_v14  ;;  %368 = vmatpush3.msra.mxu1 %v173_v17 }
  0x37   :  { %337 = vmatpush3.msra.mxu0 %v71_v14  ;;  %369 = vmatprep.subr.mxu1 %v172_v19 }
  0x38   :  { %338 = vmatprep.subr.mxu0 %v70_v16  ;;  %370 = vmatpush3.msra.mxu1 %v172_v19 }
  0x39   :  { %339 = vmatpush3.msra.mxu0 %v70_v16  ;;  %371 = vmatprep.subr.mxu1 %v171_v21 }
  0x3a   :  { %340 = vmatprep.subr.mxu0 %v69_v18  ;;  %372 = vmatpush3.msra.mxu1 %v171_v21 }
  0x3b   :  { %341 = vmatpush3.msra.mxu0 %v69_v18  ;;  %373 = vmatprep.subr.mxu1 %v170_v23 }
  0x3c   :  { %342 = vmatprep.subr.mxu0 %v68_v20  ;;  %374 = vmatpush3.msra.mxu1 %v170_v23 }
  0x3d   :  { %343 = vmatpush3.msra.mxu0 %v68_v20  ;;  %375 = vmatprep.subr.mxu1 %v169_v25 }
  0x3e   :  { %344 = vmatprep.subr.mxu0 %v67_v22  ;;  %376 = vmatpush3.msra.mxu1 %v169_v25 }
  0x3f   :  { %345 = vmatpush3.msra.mxu0 %v67_v22  ;;  %377 = vmatprep.subr.mxu1 %v168_v27 }
  0x40   :  { %346 = vmatprep.subr.mxu0 %v66_v24  ;;  %378 = vmatpush3.msra.mxu1 %v168_v27 }
  0x41   :  { %347 = vmatpush3.msra.mxu0 %v66_v24  ;;  %379 = vmatprep.subr.mxu1 %v167_v30 }
  0x42   :  { %348 = vmatprep.subr.mxu0 %v65_v26  ;;  %380 = vmatpush3.msra.mxu1 %v167_v30 }
  0x43   :  { %349 = vmatpush3.msra.mxu0 %v65_v26  ;;  %381 = vmatprep.subr.mxu1 %v166_v31 }
  0x44   :  { %350 = vmatprep.subr.mxu0 %v64_v28  ;;  %382 = vmatpush3.msra.mxu1 %v166_v31 }
  0x45   :  { %351 = vmatpush3.msra.mxu0 %v64_v28  ;;  %383 = vmatprep.subr.mxu1 %v165_v32 }
  0x46   :  { %353 = vmatmul.mubr.f32.vlgmr.msra.gmra.mxu0 %v63_v29  ;;  %384 = vmatpush3.msra.mxu1 %v165_v32 }
  0x47   :  { %385 = vmatprep.subr.mxu1 %v164_v33 }
  0x48   :  { %386 = vmatpush3.msra.mxu1 %v164_v33 }
 0x106   :  { %v354_v35 = vpop.f32.mrf.mxu0 }
 0x107   :  { %v159_v36 = vadd.f32 %v354_v35, %v282_v34 }
 0x108   :  { %v153_v37 = vpop.f32.mrf.mxu0 }
 0x109   :  { %v154_v38 = vadd.f32 %v282_v34, %v153_v37  ;;  %v163_v40 = vmax.f32 %v159_v36, 0.0 }
 0x10b   :  { %v162_v39 = vmax.f32 %v154_v38, 0.0 }
 0x10d   :  { %387 = vmatprep.mubr.f32.mxu1 %v162_v39 }
 0x10e   :  { %388 = vmatmul.mubr.f32.vlgmr.msra.gmra.mxu1 %v163_v40 }
 0x1ce   :  { %v389_v42 = vpop.f32.mrf.mxu1 }
 0x1cf   :  { %v259_v43 = vadd.f32 %v389_v42, %v283_v41 }
 0x1d0   :  { %v253_v44 = vpop.f32.mrf.mxu1 }
 0x1d1   :  { %263 = vst [vmem:[#allocation8 + $0x8] sm:$0xff] %v259_v43  ;;  %v254_v45 = vadd.f32 %v283_v41, %v253_v44 }
 0x1d3   :  { %262 = vst [vmem:[#allocation8] sm:$0xff] %v254_v45 }
 0x1d4   :  { %467 = shalt.err (!%p464_p5)
}
 0x1d5   :  { %275 = dma.vmem_to_hbm [thread:$0]  %s270_s12, 256, %s553_s5, [#allocation4], %s484_s23, %s484_s23, %s485_s24  }
 0x1d6   :  { %480 = dma.done.wait [#allocation4], 256  }
 0x1d7   :  { %481 = vsyncadd [#allocation4], 4294967040 }
 0x1d8   :  { %279 = vsyncpa [#allocation3], 1 }
 0x1d9   :  { %280 = vsyncpa [#allocation6], 1 }
 0x1da   :  { %281 = vsyncpa [#allocation4], 1 }

</bundles_post_ra>
